<compile_context>
chip_gen: v5e
topology: v5e:2x2
jax: 0.10.0
libtpu: 0.0.40
codegen_flags: <defaults>
</compile_context>

<pallas_src>
import functools
import math

import jax
import jax.numpy as jnp
from jax import lax
from jax.experimental import pallas as pl
from jax.experimental.pallas import tpu as pltpu


def _round_up(x, m):
    return (x + m - 1) // m * m


def _vmem_budget():
    """Generation-dependent scoped-VMEM budget (v5e/v6e: 128 MiB phys, v7x: 64 MiB)."""
    cap = 64 * 1024 * 1024
    try:
        cap = int(getattr(pltpu.get_tpu_info(), "vmem_capacity_bytes", cap))
    except Exception:
        pass
    return max(min(cap * 3 // 4, 100 * 1024 * 1024), 32 * 1024 * 1024)


# --------------------------- Kernel 1: fused row-tile Linear ---------------------------
def _linear_kernel(x_ref, w_ref, b_ref, o_ref):
    # x_ref: (tm, H_in); w_ref: (H_in, N) pre-transposed ONCE in the wrapper (no
    # per-step in-kernel weight transpose/layout change); b_ref: (1, N).
    acc = jnp.dot(x_ref[...], w_ref[...], preferred_element_type=jnp.float32)
    o_ref[...] = (acc + b_ref[...].astype(jnp.float32)).astype(o_ref.dtype)


_SINGLE_BUFFER_OK = True   # flipped off once if pl.Buffered(1) is rejected by this jax build


def _linear_rows(x2, w_t, b, *, vmem_limit, tm=None):
    """out[r, :] = x2[r, :] @ w_t + b over row tiles, with the weight resident in VMEM."""
    global _SINGLE_BUFFER_OK
    rows, h_in = x2.shape
    n_out = w_t.shape[1]
    isz = jnp.dtype(x2.dtype).itemsize
    row_align = max(8, 32 // isz)       # sublane packing: 8 (f32) / 16 (bf16) / 32 (int8)

    if tm is None:
        # 512-row tiles on 128-MiB-VMEM chips (v5e/v6e), 256 on v7x-class (64 MiB).
        tm = 512 if vmem_limit >= 64 * 1024 * 1024 else 256
    tm_eff = min(_round_up(tm, row_align), _round_up(rows, row_align))

    wsz = jnp.dtype(w_t.dtype).itemsize

    def vmem_use(t):
        return (2 * t * h_in * isz          # x tile, double-buffered
                + 2 * t * n_out * isz       # out tile, double-buffered
                + h_in * n_out * wsz        # resident fused weight (single-buffered)
                + n_out * 4)

    while tm_eff > row_align and vmem_use(tm_eff) > 0.8 * vmem_limit:
        tm_eff = max(row_align, _round_up(tm_eff // 2, row_align))

    rows_p = _round_up(rows, tm_eff)
    if rows_p != rows:
        x2 = jnp.pad(x2, ((0, rows_p - rows), (0, 0)))

    x_spec = pl.BlockSpec((tm_eff, h_in), lambda i: (i, 0))
    o_spec = pl.BlockSpec((tm_eff, n_out), lambda i: (i, 0))

    def run(single_buffer):
        # Grid-invariant weight/bias: single-buffer so they do not pay 2x VMEM.
        res_kw = {"pipeline_mode": pl.Buffered(1)} if single_buffer else {}
        w_spec = pl.BlockSpec((h_in, n_out), lambda i: (0, 0), **res_kw)
        b_spec = pl.BlockSpec((1, n_out), lambda i: (0, 0), **res_kw)
        return pl.pallas_call(
            _linear_kernel,
            out_shape=jax.ShapeDtypeStruct((rows_p, n_out), x2.dtype),
            grid_spec=pltpu.PrefetchScalarGridSpec(
                num_scalar_prefetch=0,
                grid=(rows_p // tm_eff,),
                in_specs=[x_spec, w_spec, b_spec],
                out_specs=o_spec,
            ),
            compiler_params=pltpu.CompilerParams(
                dimension_semantics=("parallel",),
                vmem_limit_bytes=vmem_limit,
            ),
        )(x2, w_t, b.reshape(1, n_out))

    if _SINGLE_BUFFER_OK:
        try:
            out = run(True)
        except Exception:
            _SINGLE_BUFFER_OK = False
            out = run(False)
    else:
        out = run(False)

    return out[:rows] if rows_p != rows else out


# --------------------- Kernel 2: attention over (batch, head-group, q-tile) ---------------------
def _attention_kernel(*refs, scale, hg, d, has_mask, collect_attn):
    it = iter(refs)
    q_ref, k_ref, v_ref = next(it), next(it), next(it)
    mask_ref = next(it) if has_mask else None
    ctx_ref = next(it)
    logits_ref = next(it) if collect_attn else None
    probs_ref = next(it) if collect_attn else None

    q = q_ref[0]                                   # (tq,  hg*d)
    k = k_ref[0]                                   # (s_k, hg*d)
    v = v_ref[0]                                   # (s_k, hg*d)
    mask = mask_ref[0].astype(jnp.float32) if has_mask else None   # (1|tq, s_k)

    dn = (((1,), (1,)), ((), ()))                  # q @ k^T (contract the head dim)
    ctx_cols = []
    for h in range(hg):                            # static unroll over heads in this group
        cols = slice(h * d, (h + 1) * d)
        logits = lax.dot_general(q[:, cols], k[:, cols], dn,
                                 preferred_element_type=jnp.float32)
        if collect_attn:
            # HF ret_attn_logits: raw q@k^T, pre-scale and pre-mask.
            logits_ref[0, h] = logits.astype(logits_ref.dtype)

        scores = logits * scale
        if has_mask:
            scores = scores + mask

        m = jnp.max(scores, axis=-1, keepdims=True)
        e = jnp.exp(scores - m)
        denom = jnp.sum(e, axis=-1, keepdims=True)
        # One reciprocal per query row instead of a (tq, s_k) VPU divide.  Kept exact
        # (approx=False) because probs are a returned output; flip to approx=True
        # (EUP slot, effectively free) when bit-close probs are not required.
        probs = e * pl.reciprocal(denom, approx=False)
        if collect_attn:
            probs_ref[0, h] = probs.astype(probs_ref.dtype)

        # TODO(synk): training-mode dropout on probs and the head_mask multiply are
        # omitted (identity at inference).
        ctx_cols.append(jnp.dot(probs.astype(v.dtype), v[:, cols],
                                preferred_element_type=jnp.float32))

    ctx = ctx_cols[0] if hg == 1 else jnp.concatenate(ctx_cols, axis=-1)
    ctx_ref[0] = ctx.astype(ctx_ref.dtype)         # single lane-dense (tq, hg*d) store


def _pick_head_group(nh, d):
    """Smallest head-group size hg (dividing nh) whose hg*d is 128-lane aligned."""
    for hg in range(1, nh + 1):
        if nh % hg == 0 and (hg * d) % 128 == 0:
            return hg
    return nh        # fall back to all heads per cell (handled via full-H blocks)


def _pick_q_tile(s_q, s_k, hgd, hg, itemsize, collect_attn, mq, vmem_limit):
    """Largest q tile whose per-cell VMEM footprint fits the scoped budget."""
    # TODO(synk): for very long S_k an online-softmax S_k tiling is still needed.
    def fits(tq):
        use = (2 * 2 * tq * hgd * itemsize        # q in + ctx out, double-buffered
               + 2 * 2 * s_k * hgd * itemsize     # k, v
               + (2 * 2 * hg * tq * s_k * 4 if collect_attn else 0)
               + 2 * min(mq, tq) * s_k * 4)
        return use <= 0.7 * vmem_limit
    cands = [s_q] + [c for c in (1024, 512, 256, 128, 64, 32, 16, 8)
                     if c < s_q and s_q % c == 0]
    for c in cands:
        if fits(c):
            return c
    return cands[-1]


def _attention(q_src, k_src, v_src, q_base, k_base, v_base, mask3, *,
               nh, d, hg, collect_attn, vmem_limit):
    B, s_q, _ = q_src.shape
    s_k = k_src.shape[1]
    hgd = hg * d
    n_groups = nh // hg
    scale = 1.0 / math.sqrt(d)
    out_dtype = q_src.dtype
    isz = jnp.dtype(out_dtype).itemsize

    has_mask = mask3 is not None
    mq = mask3.shape[1] if has_mask else 1

    tq = _pick_q_tile(s_q, s_k, hgd, hg, isz, collect_attn, mq, vmem_limit)
    n_q = s_q // tq

    q_spec = pl.BlockSpec((1, tq, hgd), lambda b, g, qi: (b, qi, q_base + g))
    k_spec = pl.BlockSpec((1, s_k, hgd), lambda b, g, qi: (b, 0, k_base + g))
    v_spec = pl.BlockSpec((1, s_k, hgd), lambda b, g, qi: (b, 0, v_base + g))
    ctx_spec = pl.BlockSpec((1, tq, hgd), lambda b, g, qi: (b, qi, g))

    in_specs = [q_spec, k_spec, v_spec]
    operands = [q_src, k_src, v_src]
    if has_mask:
        if mq == 1:
            in_specs.append(pl.BlockSpec((1, 1, s_k), lambda b, g, qi: (b, 0, 0)))
        else:
            in_specs.append(pl.BlockSpec((1, tq, s_k), lambda b, g, qi: (b, qi, 0)))
        operands.append(mask3)

    out_shapes = [jax.ShapeDtypeStruct((B, s_q, nh * d), out_dtype)]
    out_specs = [ctx_spec]
    if collect_attn:
        lp_spec = pl.BlockSpec((1, hg, tq, s_k), lambda b, g, qi: (b, g, qi, 0))
        out_shapes += [jax.ShapeDtypeStruct((B, nh, s_q, s_k), jnp.float32)] * 2
        out_specs += [lp_spec, lp_spec]

    kernel = functools.partial(_attention_kernel, scale=scale, hg=hg, d=d,
                               has_mask=has_mask, collect_attn=collect_attn)

    outs = pl.pallas_call(
        kernel,
        out_shape=tuple(out_shapes),
        grid_spec=pltpu.PrefetchScalarGridSpec(
            num_scalar_prefetch=0,
            grid=(B, n_groups, n_q),
            in_specs=in_specs,
            out_specs=out_specs,
        ),
        compiler_params=pltpu.CompilerParams(
            dimension_semantics=("parallel", "parallel", "parallel"),
            vmem_limit_bytes=vmem_limit,
        ),
    )(*operands)

    if collect_attn:
        return outs[0], outs[1], outs[2]
    return outs[0], None, None


def _prep_mask(attention_mask, B, s_q, s_k):
    """HF-style *additive* extended mask -> un-broadcast (B, 1|s_q, s_k) f32.

    NOTE: a raw 0/1 [B, s_k] padding mask is added as-is (same contract as the
    original module, which expects the caller to pre-extend it to additive form).
    """
    if attention_mask is None:
        return None
    m = attention_mask.astype(jnp.float32)
    if m.ndim == 4:
        m = m[:, 0]            # (B, 1|s_q, s_k); TODO(synk): per-head masks unsupported
    elif m.ndim == 2:
        m = m[:, None, :]      # (B, 1, s_k)
    if m.shape[-2] not in (1, s_q):
        m = jnp.broadcast_to(m, (B, s_q, s_k))
    return jnp.broadcast_to(m, (B, m.shape[-2], s_k))


# --------------------------- Module-level wrapper ---------------------------
def bert_self_attention(hidden_states, wq, bq, wk, bk, wv, bv,
                        num_attention_heads, attention_mask=None,
                        encoder_hidden_states=None, encoder_attention_mask=None,
                        *, compute_dtype=None, collect_attn=True):
    """Mirrors BertSelfAttention.forward (eval mode).

    Returns ((context_layer,), {'attn_logits': ..., 'attn_probs': ...}).
    compute_dtype=jnp.bfloat16 runs all MXU work at bf16 rate with f32 accumulation;
    collect_attn=False skips the attn_logits/attn_probs HBM writeback entirely.
    """
    B, s_q, H = hidden_states.shape
    nh = num_attention_heads
    assert H % nh == 0, "hidden size must be a multiple of num_attention_heads"
    d = H // nh

    if compute_dtype is not None:
        hidden_states = hidden_states.astype(compute_dtype)
        wq, wk, wv = (w.astype(compute_dtype) for w in (wq, wk, wv))
        if encoder_hidden_states is not None:
            encoder_hidden_states = encoder_hidden_states.astype(compute_dtype)

    vmem_limit = _vmem_budget()
    hg = _pick_head_group(nh, d)
    hgd = hg * d
    n_groups = nh // hg
    fused_cols_ok = (hgd % 128 == 0)

    if encoder_hidden_states is None:
        # Self-attention: one fused QKV matmul against a resident [H, 3H] weight.
        s_k = s_q
        w_qkv_t = jnp.concatenate([wq, wk, wv], axis=0).T       # one-time XLA transpose
        b_qkv = jnp.concatenate([bq, bk, bv], axis=0)
        qkv3 = _linear_rows(hidden_states.reshape(B * s_q, H), w_qkv_t, b_qkv,
                            vmem_limit=vmem_limit).reshape(B, s_q, 3 * H)
        if fused_cols_ok:
            # Attention reads q/k/v straight out of the fused (B, S, 3H) buffer via
            # column-block index_maps -- no wrapper-side slicing or head transposes.
            q_src = k_src = v_src = qkv3
            q_base, k_base, v_base = 0, n_groups, 2 * n_groups
        else:
            q_src = qkv3[..., :H]
            k_src = qkv3[..., H:2 * H]
            v_src = qkv3[..., 2 * H:]
            q_base = k_base = v_base = 0
    else:
        # Cross-attention: dedicated Q-only and fused KV-only projections.
        attention_mask = encoder_attention_mask
        s_k = encoder_hidden_states.shape[1]
        q_src = _linear_rows(hidden_states.reshape(B * s_q, H), wq.T, bq,
                             vmem_limit=vmem_limit).reshape(B, s_q, H)
        w_kv_t = jnp.concatenate([wk, wv], axis=0).T
        b_kv = jnp.concatenate([bk, bv], axis=0)
        kv3 = _linear_rows(encoder_hidden_states.reshape(B * s_k, H), w_kv_t, b_kv,
                           vmem_limit=vmem_limit).reshape(B, s_k, 2 * H)
        q_base = 0
        if fused_cols_ok:
            k_src = v_src = kv3
            k_base, v_base = 0, n_groups
        else:
            k_src, v_src = kv3[..., :H], kv3[..., H:]
            k_base = v_base = 0

    mask3 = _prep_mask(attention_mask, B, s_q, s_k)

    context, logits, probs = _attention(
        q_src, k_src, v_src, q_base, k_base, v_base, mask3,
        nh=nh, d=d, hg=hg, collect_attn=collect_attn, vmem_limit=vmem_limit)

    return (context,), {"attn_logits": logits, "attn_probs": probs}


# --------------------------- Pure-JAX reference ---------------------------
def _reference(hidden_states, wq, bq, wk, bk, wv, bv, nh,
               attention_mask=None, encoder_hidden_states=None):
    B, S, H = hidden_states.shape
    d = H // nh
    kv_in = hidden_states if encoder_hidden_states is None else encoder_hidden_states
    Sk = kv_in.shape[1]

    def lin(x, w, b):
        return jnp.einsum("bsh,oh->bso", x, w) + b

    def heads(x, s):
        return x.reshape(B, s, nh, d).transpose(0, 2, 1, 3)

    q = heads(lin(hidden_states, wq, bq), S)
    k = heads(lin(kv_in, wk, bk), Sk)
    v = heads(lin(kv_in, wv, bv), Sk)
    logits = jnp.einsum("bhqd,bhkd->bhqk", q, k)
    scores = logits / math.sqrt(d)
    if attention_mask is not None:
        scores = scores + attention_mask
    probs = jax.nn.softmax(scores, axis=-1)
    ctx = jnp.einsum("bhqk,bhkd->bhqd", probs, v)
    ctx = ctx.transpose(0, 2, 1, 3).reshape(B, S, H)
    return ctx, logits, probs


if __name__ == "__main__":
    B, S, H, NH = 2, 16, 128, 4

    key = jax.random.PRNGKey(0)
    ks = jax.random.split(key, 9)
    hidden_states = jax.random.normal(ks[0], (B, S, H), dtype=jnp.float32)

    w_scale = 1.0 / math.sqrt(H)
    wq = jax.random.normal(ks[1], (H, H), dtype=jnp.float32) * w_scale
    wk = jax.random.normal(ks[2], (H, H), dtype=jnp.float32) * w_scale
    wv = jax.random.normal(ks[3], (H, H), dtype=jnp.float32) * w_scale
    bq = 0.02 * jax.random.normal(ks[4], (H,), dtype=jnp.float32)
    bk = 0.02 * jax.random.normal(ks[5], (H,), dtype=jnp.float32)
    bv = 0.02 * jax.random.normal(ks[6], (H,), dtype=jnp.float32)

    # HF-style additive extended mask [B, 1, 1, S]: mask the last 3 keys of batch 1.
    valid = jnp.ones((B, S), jnp.float32).at[1, -3:].set(0.0)
    attention_mask = (1.0 - valid)[:, None, None, :] * -1e9

    # ---- Self-attention path ----
    outputs, attn_info = bert_self_attention(
        hidden_states, wq, bq, wk, bk, wv, bv, NH, attention_mask=attention_mask)
    context = jax.block_until_ready(outputs[0])
    logits, probs = attn_info["attn_logits"], attn_info["attn_probs"]

    ref_ctx, ref_logits, ref_probs = _reference(
        hidden_states, wq, bq, wk, bk, wv, bv, NH, attention_mask)

    assert context.shape == (B, S, H)
    assert logits.shape == (B, NH, S, S) and probs.shape == (B, NH, S, S)
    assert jnp.allclose(context, ref_ctx, atol=1e-3, rtol=1e-3), "context mismatch"
    assert jnp.allclose(logits, ref_logits, atol=1e-3, rtol=1e-3), "logits mismatch"
    assert jnp.allclose(probs, ref_probs, atol=1e-3, rtol=1e-3), "probs mismatch"

    # ---- Cross-attention path (dedicated Q-only / fused KV-only projections) ----
    Sk = 8
    enc = jax.random.normal(ks[7], (B, Sk, H), dtype=jnp.float32)
    enc_valid = jnp.ones((B, Sk), jnp.float32).at[0, -2:].set(0.0)
    enc_mask = (1.0 - enc_valid)[:, None, None, :] * -1e9

    (x_ctx,), x_info = bert_self_attention(
        hidden_states, wq, bq, wk, bk, wv, bv, NH,
        encoder_hidden_states=enc, encoder_attention_mask=enc_mask)
    x_ctx = jax.block_until_ready(x_ctx)

    rx_ctx, rx_logits, rx_probs = _reference(
        hidden_states, wq, bq, wk, bk, wv, bv, NH, enc_mask, encoder_hidden_states=enc)

    assert x_ctx.shape == (B, S, H)
    assert x_info["attn_probs"].shape == (B, NH, S, Sk)
    assert jnp.allclose(x_ctx, rx_ctx, atol=1e-3, rtol=1e-3), "cross context mismatch"
    assert jnp.allclose(x_info["attn_logits"], rx_logits, atol=1e-3, rtol=1e-3), "cross logits mismatch"
    assert jnp.allclose(x_info["attn_probs"], rx_probs, atol=1e-3, rtol=1e-3), "cross probs mismatch"

    print("KERNEL_OK")
</pallas_src>

<mosaic_0001>
module attributes {stable_mosaic.version = 11 : i64} {
  func.func @_linear_kernel(%arg0: i32, %arg1: memref<32x128xf32, #tpu.memory_space<vmem>>, %arg2: memref<128x384xf32, #tpu.memory_space<vmem>>, %arg3: memref<1x384xf32, #tpu.memory_space<vmem>>, %arg4: memref<32x384xf32, #tpu.memory_space<vmem>>) attributes {dimension_semantics = [#tpu.dimension_semantics<parallel>], iteration_bounds = array<i64: 1>, scalar_prefetch = 0 : i64, scratch_operands = 0 : i64, tpu.core_type = #tpu.core_type<tc>, window_params = [{transform_indices = @transform_0, window_bounds = array<i64: 32, 128>}, {pipeline_mode = #tpu.pipeline_mode<synchronous>, transform_indices = @transform_1, window_bounds = array<i64: 128, 384>}, {pipeline_mode = #tpu.pipeline_mode<synchronous>, transform_indices = @transform_2, window_bounds = array<i64: 1, 384>}, {transform_indices = @transform_3, window_bounds = array<i64: 32, 384>}]} {
    %c0 = arith.constant 0 : index
    %c0_0 = arith.constant 0 : index
    %0 = vector.load %arg1[%c0, %c0_0] : memref<32x128xf32, #tpu.memory_space<vmem>>, vector<32x128xf32>
    %c0_1 = arith.constant 0 : index
    %c0_2 = arith.constant 0 : index
    %1 = vector.load %arg2[%c0_1, %c0_2] : memref<128x384xf32, #tpu.memory_space<vmem>>, vector<128x384xf32>
    %cst = arith.constant dense<0.000000e+00> : vector<32x384xf32>
    %2 = tpu.matmul %0, %1, %cst {dimension_numbers = #tpu.dot_dimension_numbers<[1], [0], [0], [1], [0, 0, 1, 1], [], []>} : vector<32x128xf32>, vector<128x384xf32>, vector<32x384xf32> -> vector<32x384xf32>
    %c0_3 = arith.constant 0 : index
    %c0_4 = arith.constant 0 : index
    %3 = vector.load %arg3[%c0_3, %c0_4] : memref<1x384xf32, #tpu.memory_space<vmem>>, vector<1x384xf32>
    %4 = vector.broadcast %3 : vector<1x384xf32> to vector<32x384xf32>
    %5 = arith.addf %2, %4 : vector<32x384xf32>
    %c0_5 = arith.constant 0 : index
    %c0_6 = arith.constant 0 : index
    %6 = vector.load %arg4[%c0_5, %c0_6] : memref<32x384xf32, #tpu.memory_space<vmem>>, vector<32x384xf32>
    tpu.vector_store %arg4[%c0_5, %c0_6], %5 {strides = array<i32>} : memref<32x384xf32, #tpu.memory_space<vmem>>, vector<32x384xf32>,
    return
  }
  func.func @transform_0(%arg0: i32) -> (i32, i32) {
    %c0_i32 = arith.constant 0 : i32
    %c0_i32_0 = arith.constant 0 : i32
    return %arg0, %c0_i32 : i32, i32
  }
  func.func @transform_1(%arg0: i32) -> (i32, i32) {
    %c0_i32 = arith.constant 0 : i32
    %c0_i32_0 = arith.constant 0 : i32
    %c0_i32_1 = arith.constant 0 : i32
    return %c0_i32, %c0_i32_0 : i32, i32
  }
  func.func @transform_2(%arg0: i32) -> (i32, i32) {
    %c0_i32 = arith.constant 0 : i32
    %c0_i32_0 = arith.constant 0 : i32
    %c0_i32_1 = arith.constant 0 : i32
    return %c0_i32, %c0_i32_0 : i32, i32
  }
  func.func @transform_3(%arg0: i32) -> (i32, i32) {
    %c0_i32 = arith.constant 0 : i32
    %c0_i32_0 = arith.constant 0 : i32
    return %arg0, %c0_i32 : i32, i32
  }
}

module attributes {stable_mosaic.version = 11 : i64} {
  func.func @_linear_kernel(%arg0: i32, %arg1: memref<32x128xf32, #tpu.memory_space<vmem>>, %arg2: memref<128x384xf32, #tpu.memory_space<vmem>>, %arg3: memref<1x384xf32, #tpu.memory_space<vmem>>, %arg4: memref<32x384xf32, #tpu.memory_space<vmem>>) attributes {dimension_semantics = [#tpu.dimension_semantics<parallel>], iteration_bounds = array<i64: 1>, scalar_prefetch = 0 : i64, scratch_operands = 0 : i64, tpu.core_type = #tpu.core_type<tc>, window_params = [{transform_indices = @transform_0, window_bounds = array<i64: 32, 128>}, {pipeline_mode = #tpu.pipeline_mode<synchronous>, transform_indices = @transform_1, window_bounds = array<i64: 128, 384>}, {pipeline_mode = #tpu.pipeline_mode<synchronous>, transform_indices = @transform_2, window_bounds = array<i64: 1, 384>}, {transform_indices = @transform_3, window_bounds = array<i64: 32, 384>}]} {
    %c0 = arith.constant 0 : index
    %c0_0 = arith.constant 0 : index
    %0 = vector.load %arg1[%c0, %c0_0] : memref<32x128xf32, #tpu.memory_space<vmem>>, vector<32x128xf32>
    %c0_1 = arith.constant 0 : index
    %c0_2 = arith.constant 0 : index
    %1 = vector.load %arg2[%c0_1, %c0_2] : memref<128x384xf32, #tpu.memory_space<vmem>>, vector<128x384xf32>
    %cst = arith.constant dense<0.000000e+00> : vector<32x384xf32>
    %2 = tpu.matmul %0, %1, %cst {dimension_numbers = #tpu.dot_dimension_numbers<[1], [0], [0], [1], [0, 0, 1, 1], [], []>} : vector<32x128xf32>, vector<128x384xf32>, vector<32x384xf32> -> vector<32x384xf32>
    %c0_3 = arith.constant 0 : index
    %c0_4 = arith.constant 0 : index
    %3 = vector.load %arg3[%c0_3, %c0_4] : memref<1x384xf32, #tpu.memory_space<vmem>>, vector<1x384xf32>
    %4 = vector.broadcast %3 : vector<1x384xf32> to vector<32x384xf32>
    %5 = arith.addf %2, %4 : vector<32x384xf32>
    %c0_5 = arith.constant 0 : index
    %c0_6 = arith.constant 0 : index
    %6 = vector.load %arg4[%c0_5, %c0_6] : memref<32x384xf32, #tpu.memory_space<vmem>>, vector<32x384xf32>
    tpu.vector_store %arg4[%c0_5, %c0_6], %5 {strides = array<i32>} : memref<32x384xf32, #tpu.memory_space<vmem>>, vector<32x384xf32>,
    return
  }
  func.func @transform_0(%arg0: i32) -> (i32, i32) {
    %c0_i32 = arith.constant 0 : i32
    %c0_i32_0 = arith.constant 0 : i32
    return %arg0, %c0_i32 : i32, i32
  }
  func.func @transform_1(%arg0: i32) -> (i32, i32) {
    %c0_i32 = arith.constant 0 : i32
    %c0_i32_0 = arith.constant 0 : i32
    %c0_i32_1 = arith.constant 0 : i32
    return %c0_i32, %c0_i32_0 : i32, i32
  }
  func.func @transform_2(%arg0: i32) -> (i32, i32) {
    %c0_i32 = arith.constant 0 : i32
    %c0_i32_0 = arith.constant 0 : i32
    %c0_i32_1 = arith.constant 0 : i32
    return %c0_i32, %c0_i32_0 : i32, i32
  }
  func.func @transform_3(%arg0: i32) -> (i32, i32) {
    %c0_i32 = arith.constant 0 : i32
    %c0_i32_0 = arith.constant 0 : i32
    return %arg0, %c0_i32 : i32, i32
  }
}

</mosaic_0001>

<bundles_post_ra>
// kernel: tpu_custom_call.1
= control target key start
LH: loop header
LB: loop body
LE: loop exit
PB: predicated region body
PF: predicated region fallthrough
CT: control target
= control target key end

     0   :  { %8 = vsyncpa [#allocation3], 0  ;;  %s411_s0 = inlined_call_operand.hbm [shape: f32[32,128], index: 0, kind: input, shape index: {}]   ;;  %s412_s1 = inlined_call_operand.hbm [shape: f32[128,384], index: 1, kind: input, shape index: {}]   ;;  %s413_s2 = inlined_call_operand.hbm [shape: f32[1,384], index: 2, kind: input, shape index: {}]   ;;  %s414_s3 = inlined_call_operand.hbm [shape: f32[32,384], index: 3, kind: output, shape index: {}]  }
   0x1   :  { %9 = vsyncpa [#allocation6], 0  ;;  %s28_s14 = sshll.u32 %s412_s1, 4  ;;  %s29_s14 = int_to_ptr.hbm [resolvable:$true] %s28_s14 }
   0x2   :  { %10 = vsyncpa [#allocation4], 0  ;;  %s365_s15 = smov [#allocation5]   ;;  %s15_s19 = sshll.u32 %s411_s0, 4  ;;  %s16_s19 = int_to_ptr.hbm [resolvable:$true] %s15_s19 }
   0x3   :  { %s30_s16 = sshll.u32 %s365_s15, 4  ;;  %s366_s20 = smov 384   ;;  %s31_s16 = int_to_ptr.vmem [resolvable:$true] %s30_s16 }
   0x4   :  { %s367_s21 = smov 24   ;;  %s368_s22 = smov [#allocation2]  }
   0x5   :  { %36 = dma.hbm_to_vmem [thread:$0]  %s29_s14, 6144, %s31_s16, [#allocation6], %s366_s20, %s366_s20, %s367_s21  }
   0x6   :  { %s17_s23 = sshll.u32 %s368_s22, 4  ;;  %s369_s1 = smov 128   ;;  %s18_s23 = int_to_ptr.vmem [resolvable:$true] %s17_s23 }
   0x7   :  { %s370_s24 = smov 8   ;;  %s42_s27 = sshll.u32 %s413_s2, 4  ;;  %s43_s27 = int_to_ptr.hbm [resolvable:$true] %s42_s27 }
   0x8   :  { %23 = dma.hbm_to_vmem [thread:$0]  %s16_s19, 512, %s18_s23, [#allocation3], %s369_s1, %s369_s1, %s370_s24  }
   0x9   :  { %s371_s28 = smov [#allocation7]  }
   0xa   :  { %s44_s0 = sshll.u32 %s371_s28, 4  ;;  %s45_s0 = int_to_ptr.vmem [resolvable:$true] %s44_s0 }
   0xb   :  { %47 = dma.hbm_to_vmem [thread:$0]  %s43_s27, 48, %s45_s0, [#allocation6]  }
   0xc   :  { %359 = dma.done.wait [#allocation3], 512  }
   0xd   :  { %360 = vsyncadd [#allocation3], 4294966784 }
   0xe   :  { %361 = dma.done.wait [#allocation6], 6192  }
   0xf   :  { %362 = vsyncadd [#allocation6], 4294961104  ;;  %v111_v0 = vld [vmem:[#allocation5 + $0x178] sm:$0xff]  ;;  %v108_v1 = vld [vmem:[#allocation5 + $0x160] sm:$0xff]  ;;  %s372_s2 = smov [#allocation8]   ;;  %s225_s5 = sshll.u32 %s414_s3, 4  ;;  %s226_s5 = int_to_ptr.hbm [resolvable:$true] %s225_s5 }
  0x10   :  { %178 = vmatpush.msra.mxu2 %v111_v0  ;;  %v110_v2 = vld [vmem:[#allocation5 + $0x170] sm:$0xff]  ;;  %v109_v3 = vld [vmem:[#allocation5 + $0x168] sm:$0xff]  ;;  %v107_v5 = vld [vmem:[#allocation5 + $0x158] sm:$0xff]  ;;  %s223_s29 = sshll.u32 %s372_s2, 4  ;;  %s224_s29 = int_to_ptr.vmem [resolvable:$true] %s223_s29 }
  0x11   :  { %v105_v4 = vld [vmem:[#allocation5 + $0x148] sm:$0xff]  ;;  %149 = vmatpush.msra.mxu1 %v110_v2  ;;  %239 = vmatpush.msra.mxu3 %v109_v3  ;;  %v106_v6 = vld [vmem:[#allocation5 + $0x150] sm:$0xff]  ;;  %v104_v7 = vld [vmem:[#allocation5 + $0x140] sm:$0xff] }
  0x12   :  { %179 = vmatpush.msra.mxu2 %v108_v1  ;;  %v103_v8 = vld [vmem:[#allocation5 + $0x138] sm:$0xff]  ;;  %120 = vmatpush.msra.mxu0 %v109_v3  ;;  %v102_v9 = vld [vmem:[#allocation5 + $0x130] sm:$0xff]  ;;  %v101_v10 = vld [vmem:[#allocation5 + $0x128] sm:$0xff] }
  0x13   :  { %150 = vmatpush.msra.mxu1 %v107_v5  ;;  %240 = vmatpush.msra.mxu3 %v106_v6  ;;  %v100_v11 = vld [vmem:[#allocation5 + $0x120] sm:$0xff]  ;;  %v99_v12 = vld [vmem:[#allocation5 + $0x118] sm:$0xff]  ;;  %v98_v13 = vld [vmem:[#allocation5 + $0x110] sm:$0xff] }
  0x14   :  { %180 = vmatpush.msra.mxu2 %v105_v4  ;;  %121 = vmatpush.msra.mxu0 %v106_v6  ;;  %v97_v14 = vld [vmem:[#allocation5 + $0x108] sm:$0xff]  ;;  %v96_v15 = vld [vmem:[#allocation5 + $0x100] sm:$0xff]  ;;  %v95_v16 = vld [vmem:[#allocation5 + $0xf8] sm:$0xff] }
  0x15   :  { %151 = vmatpush.msra.mxu1 %v104_v7  ;;  %241 = vmatpush.msra.mxu3 %v103_v8  ;;  %v94_v17 = vld [vmem:[#allocation5 + $0xf0] sm:$0xff]  ;;  %v93_v18 = vld [vmem:[#allocation5 + $0xe8] sm:$0xff]  ;;  %v92_v19 = vld [vmem:[#allocation5 + $0xe0] sm:$0xff] }
  0x16   :  { %181 = vmatpush.msra.mxu2 %v102_v9  ;;  %122 = vmatpush.msra.mxu0 %v103_v8  ;;  %v91_v20 = vld [vmem:[#allocation5 + $0xd8] sm:$0xff]  ;;  %v90_v21 = vld [vmem:[#allocation5 + $0xd0] sm:$0xff]  ;;  %v89_v22 = vld [vmem:[#allocation5 + $0xc8] sm:$0xff] }
  0x17   :  { %152 = vmatpush.msra.mxu1 %v101_v10  ;;  %242 = vmatpush.msra.mxu3 %v100_v11  ;;  %v88_v23 = vld [vmem:[#allocation5 + $0xc0] sm:$0xff]  ;;  %v87_v24 = vld [vmem:[#allocation5 + $0xb8] sm:$0xff]  ;;  %v86_v25 = vld [vmem:[#allocation5 + $0xb0] sm:$0xff] }
  0x18   :  { %182 = vmatpush.msra.mxu2 %v99_v12  ;;  %123 = vmatpush.msra.mxu0 %v100_v11  ;;  %v85_v26 = vld [vmem:[#allocation5 + $0xa8] sm:$0xff]  ;;  %v84_v27 = vld [vmem:[#allocation5 + $0xa0] sm:$0xff]  ;;  %v83_v28 = vld [vmem:[#allocation5 + $0x98] sm:$0xff] }
  0x19   :  { %153 = vmatpush.msra.mxu1 %v98_v13  ;;  %243 = vmatpush.msra.mxu3 %v97_v14  ;;  %v82_v29 = vld [vmem:[#allocation5 + $0x90] sm:$0xff]  ;;  %v81_v30 = vld [vmem:[#allocation5 + $0x88] sm:$0xff]  ;;  %v80_v31 = vld [vmem:[#allocation5 + $0x80] sm:$0xff] }
  0x1a   :  { %183 = vmatpush.msra.mxu2 %v96_v15  ;;  %124 = vmatpush.msra.mxu0 %v97_v14  ;;  %v79_v32 = vld [vmem:[#allocation5 + $0x78] sm:$0xff]  ;;  %v78_v33 = vld [vmem:[#allocation5 + $0x70] sm:$0xff]  ;;  %v77_v34 = vld [vmem:[#allocation5 + $0x68] sm:$0xff] }
  0x1b   :  { %154 = vmatpush.msra.mxu1 %v95_v16  ;;  %244 = vmatpush.msra.mxu3 %v94_v17  ;;  %v76_v35 = vld [vmem:[#allocation5 + $0x60] sm:$0xff]  ;;  %v75_v36 = vld [vmem:[#allocation5 + $0x58] sm:$0xff]  ;;  %v74_v37 = vld [vmem:[#allocation5 + $0x50] sm:$0xff] }
  0x1c   :  { %184 = vmatpush.msra.mxu2 %v93_v18  ;;  %125 = vmatpush.msra.mxu0 %v94_v17  ;;  %v73_v38 = vld [vmem:[#allocation5 + $0x48] sm:$0xff]  ;;  %v72_v39 = vld [vmem:[#allocation5 + $0x40] sm:$0xff]  ;;  %v71_v40 = vld [vmem:[#allocation5 + $0x38] sm:$0xff] }
  0x1d   :  { %155 = vmatpush.msra.mxu1 %v92_v19  ;;  %245 = vmatpush.msra.mxu3 %v91_v20  ;;  %v70_v41 = vld [vmem:[#allocation5 + $0x30] sm:$0xff]  ;;  %v69_v42 = vld [vmem:[#allocation5 + $0x28] sm:$0xff]  ;;  %v68_v43 = vld [vmem:[#allocation5 + $0x20] sm:$0xff] }
  0x1e   :  { %185 = vmatpush.msra.mxu2 %v90_v21  ;;  %126 = vmatpush.msra.mxu0 %v91_v20  ;;  %v67_v44 = vld [vmem:[#allocation5 + $0x18] sm:$0xff]  ;;  %v66_v45 = vld [vmem:[#allocation5 + $0x10] sm:$0xff]  ;;  %v60_v46 = vld [vmem:[#allocation2] sm:$0xff] }
  0x1f   :  { %156 = vmatpush.msra.mxu1 %v89_v22  ;;  %246 = vmatpush.msra.mxu3 %v88_v23  ;;  %v65_v47 = vld [vmem:[#allocation5 + $0x8] sm:$0xff]  ;;  %v64_v48 = vld [vmem:[#allocation5] sm:$0xff]  ;;  %v62_v50 = vld [vmem:[#allocation2 + $0x10] sm:$0xff] }
  0x20   :  { %186 = vmatpush.msra.mxu2 %v87_v24  ;;  %127 = vmatpush.msra.mxu0 %v88_v23  ;;  %v61_v49 = vld [vmem:[#allocation2 + $0x8] sm:$0xff]  ;;  %v63_v51 = vld [vmem:[#allocation2 + $0x18] sm:$0xff]  ;;  %v112_v52 = vld [vmem:[#allocation7] sm:$0x7] }
  0x21   :  { %157 = vmatpush.msra.mxu1 %v86_v25  ;;  %247 = vmatpush.msra.mxu3 %v85_v26  ;;  %v115_v53 = vperm.slane %v112_v52, 1  ;;  %v114_v56 = vperm.slane %v112_v52, 0  ;;  %v116_v57 = vperm.slane %v112_v52, 2 }
  0x22   :  { %187 = vmatpush.msra.mxu2 %v84_v27  ;;  %128 = vmatpush.msra.mxu0 %v85_v26 }
  0x23   :  { %158 = vmatpush.msra.mxu1 %v83_v28  ;;  %248 = vmatpush.msra.mxu3 %v82_v29 }
  0x24   :  { %188 = vmatpush.msra.mxu2 %v81_v30  ;;  %129 = vmatpush.msra.mxu0 %v82_v29 }
  0x25   :  { %159 = vmatpush.msra.mxu1 %v80_v31  ;;  %249 = vmatpush.msra.mxu3 %v79_v32 }
  0x26   :  { %189 = vmatpush.msra.mxu2 %v78_v33  ;;  %130 = vmatpush.msra.mxu0 %v79_v32 }
  0x27   :  { %160 = vmatpush.msra.mxu1 %v77_v34  ;;  %250 = vmatpush.msra.mxu3 %v76_v35 }
  0x28   :  { %190 = vmatpush.msra.mxu2 %v75_v36  ;;  %131 = vmatpush.msra.mxu0 %v76_v35 }
  0x29   :  { %161 = vmatpush.msra.mxu1 %v74_v37  ;;  %251 = vmatpush.msra.mxu3 %v73_v38 }
  0x2a   :  { %191 = vmatpush.msra.mxu2 %v72_v39  ;;  %132 = vmatpush.msra.mxu0 %v73_v38 }
  0x2b   :  { %162 = vmatpush.msra.mxu1 %v71_v40  ;;  %252 = vmatpush.msra.mxu3 %v70_v41 }
  0x2c   :  { %192 = vmatpush.msra.mxu2 %v69_v42  ;;  %133 = vmatpush.msra.mxu0 %v70_v41 }
  0x2d   :  { %163 = vmatpush.msra.mxu1 %v68_v43  ;;  %253 = vmatpush.msra.mxu3 %v67_v44 }
  0x2e   :  { %193 = vmatpush.msra.mxu2 %v66_v45  ;;  %134 = vmatpush.msra.mxu0 %v67_v44 }
  0x2f   :  { %194 = vmatmul.f32.vlgmr.msra.gmra.mxu2 %v60_v46  ;;  %164 = vmatpush.msra.mxu1 %v65_v47 }
  0x30   :  { %165 = vmatmul.f32.vlgmr.msra.gmra.mxu1 %v60_v46  ;;  %254 = vmatpush.msra.mxu3 %v64_v48 }
  0x31   :  { %139 = vmatmul.f32.vlgmr.msra.gmra.mxu3 %v61_v49  ;;  %135 = vmatpush.msra.mxu0 %v64_v48 }
  0x32   :  { %136 = vmatmul.f32.vlgmr.msra.gmra.mxu0 %v60_v46 }
  0x37   :  { %197 = vmatmul.f32.gmra.mxu2 %v61_v49 }
  0x38   :  { %168 = vmatmul.f32.gmra.mxu1 %v61_v49 }
  0x39   :  { %142 = vmatmul.f32.gmra.mxu3 %v62_v50 }
  0x3f   :  { %200 = vmatmul.f32.gmra.mxu2 %v62_v50 }
  0x40   :  { %171 = vmatmul.f32.gmra.mxu1 %v62_v50 }
  0x41   :  { %145 = vmatmul.f32.gmra.mxu3 %v63_v51 }
  0x47   :  { %203 = vmatmul.f32.gmra.mxu2 %v63_v51 }
  0x48   :  { %174 = vmatmul.f32.gmra.mxu1 %v63_v51 }
  0xad   :  { %v166_v54 = vpop.f32.mrf.mxu1 }
  0xae   :  { %v167_v55 = vadd.f32 %v166_v54, %v115_v53 }
  0xaf   :  { %v137_v58 = vpop.f32.mrf.mxu0 }
  0xb0   :  { %208 = vst [vmem:[#allocation8 + $0x8] sm:$0xff] %v167_v55  ;;  %v138_v59 = vadd.f32 %v137_v58, %v114_v56 }
  0xb2   :  { %v195_v60 = vpop.f32.mrf.mxu2  ;;  %207 = vst [vmem:[#allocation8] sm:$0xff] %v138_v59 }
  0xb3   :  { %v196_v61 = vadd.f32 %v195_v60, %v116_v57 }
  0xb4   :  { %v140_v62 = vpop.f32.mrf.mxu3 }
  0xb5   :  { %209 = vst [vmem:[#allocation8 + $0x10] sm:$0xff] %v196_v61  ;;  %v141_v63 = vadd.f32 %v140_v62, %v114_v56  ;;  %v169_v0 = vpop.f32.mrf.mxu1 }
  0xb6   :  { %v170_v1 = vadd.f32 %v169_v0, %v115_v53 }
  0xb7   :  { %210 = vst [vmem:[#allocation8 + $0x18] sm:$0xff] %v141_v63 }
  0xb8   :  { %211 = vst [vmem:[#allocation8 + $0x20] sm:$0xff] %v170_v1 }
  0xba   :  { %v198_v2 = vpop.f32.mrf.mxu2 }
  0xbb   :  { %v199_v3 = vadd.f32 %v198_v2, %v116_v57 }
  0xbc   :  { %v143_v4 = vpop.f32.mrf.mxu3 }
  0xbd   :  { %212 = vst [vmem:[#allocation8 + $0x28] sm:$0xff] %v199_v3  ;;  %v144_v5 = vadd.f32 %v143_v4, %v114_v56  ;;  %v172_v6 = vpop.f32.mrf.mxu1 }
  0xbe   :  { %v173_v7 = vadd.f32 %v172_v6, %v115_v53 }
  0xbf   :  { %213 = vst [vmem:[#allocation8 + $0x30] sm:$0xff] %v144_v5 }
  0xc0   :  { %214 = vst [vmem:[#allocation8 + $0x38] sm:$0xff] %v173_v7 }
  0xc2   :  { %v201_v8 = vpop.f32.mrf.mxu2 }
  0xc3   :  { %v202_v9 = vadd.f32 %v201_v8, %v116_v57 }
  0xc4   :  { %v146_v10 = vpop.f32.mrf.mxu3 }
  0xc5   :  { %215 = vst [vmem:[#allocation8 + $0x40] sm:$0xff] %v202_v9  ;;  %v147_v11 = vadd.f32 %v146_v10, %v114_v56  ;;  %v175_v12 = vpop.f32.mrf.mxu1 }
  0xc6   :  { %v176_v13 = vadd.f32 %v175_v12, %v115_v53 }
  0xc7   :  { %216 = vst [vmem:[#allocation8 + $0x48] sm:$0xff] %v147_v11 }
  0xc8   :  { %217 = vst [vmem:[#allocation8 + $0x50] sm:$0xff] %v176_v13 }
  0xca   :  { %v204_v14 = vpop.f32.mrf.mxu2 }
  0xcb   :  { %v205_v15 = vadd.f32 %v204_v14, %v116_v57 }
  0xcd   :  { %218 = vst [vmem:[#allocation8 + $0x58] sm:$0xff] %v205_v15 }
  0xce   :  { %231 = dma.vmem_to_hbm [thread:$0]  %s224_s29, 1536, %s226_s5, [#allocation4], %s366_s20, %s366_s20, %s367_s21  }
  0xcf   :  { %363 = dma.done.wait [#allocation4], 1536  }
  0xd0   :  { %364 = vsyncadd [#allocation4], 4294965760 }
  0xd1   :  { %236 = vsyncpa [#allocation3], 1 }
  0xd2   :  { %237 = vsyncpa [#allocation6], 1 }
  0xd3   :  { %238 = vsyncpa [#allocation4], 1 }

// kernel: tpu_custom_call.1
= control target key start
LH: loop header
LB: loop body
LE: loop exit
PB: predicated region body
PF: predicated region fallthrough
CT: control target
= control target key end

     0   :  { %8 = vsyncpa [#allocation3], 0  ;;  %s411_s0 = inlined_call_operand.hbm [shape: f32[32,128], index: 0, kind: input, shape index: {}]   ;;  %s412_s1 = inlined_call_operand.hbm [shape: f32[128,384], index: 1, kind: input, shape index: {}]   ;;  %s413_s2 = inlined_call_operand.hbm [shape: f32[1,384], index: 2, kind: input, shape index: {}]   ;;  %s414_s3 = inlined_call_operand.hbm [shape: f32[32,384], index: 3, kind: output, shape index: {}]  }
   0x1   :  { %9 = vsyncpa [#allocation6], 0  ;;  %s28_s14 = sshll.u32 %s412_s1, 4  ;;  %s29_s14 = int_to_ptr.hbm [resolvable:$true] %s28_s14 }
   0x2   :  { %10 = vsyncpa [#allocation4], 0  ;;  %s365_s15 = smov [#allocation5]   ;;  %s15_s19 = sshll.u32 %s411_s0, 4  ;;  %s16_s19 = int_to_ptr.hbm [resolvable:$true] %s15_s19 }
   0x3   :  { %s30_s16 = sshll.u32 %s365_s15, 4  ;;  %s366_s20 = smov 384   ;;  %s31_s16 = int_to_ptr.vmem [resolvable:$true] %s30_s16 }
   0x4   :  { %s367_s21 = smov 24   ;;  %s368_s22 = smov [#allocation2]  }
   0x5   :  { %36 = dma.hbm_to_vmem [thread:$0]  %s29_s14, 6144, %s31_s16, [#allocation6], %s366_s20, %s366_s20, %s367_s21  }
   0x6   :  { %s17_s23 = sshll.u32 %s368_s22, 4  ;;  %s369_s1 = smov 128   ;;  %s18_s23 = int_to_ptr.vmem [resolvable:$true] %s17_s23 }
   0x7   :  { %s370_s24 = smov 8   ;;  %s42_s27 = sshll.u32 %s413_s2, 4  ;;  %s43_s27 = int_to_ptr.hbm [resolvable:$true] %s42_s27 }
   0x8   :  { %23 = dma.hbm_to_vmem [thread:$0]  %s16_s19, 512, %s18_s23, [#allocation3], %s369_s1, %s369_s1, %s370_s24  }
   0x9   :  { %s371_s28 = smov [#allocation7]  }
   0xa   :  { %s44_s0 = sshll.u32 %s371_s28, 4  ;;  %s45_s0 = int_to_ptr.vmem [resolvable:$true] %s44_s0 }
   0xb   :  { %47 = dma.hbm_to_vmem [thread:$0]  %s43_s27, 48, %s45_s0, [#allocation6]  }
   0xc   :  { %359 = dma.done.wait [#allocation3], 512  }
   0xd   :  { %360 = vsyncadd [#allocation3], 4294966784 }
   0xe   :  { %361 = dma.done.wait [#allocation6], 6192  }
   0xf   :  { %362 = vsyncadd [#allocation6], 4294961104  ;;  %v111_v0 = vld [vmem:[#allocation5 + $0x178] sm:$0xff]  ;;  %v108_v1 = vld [vmem:[#allocation5 + $0x160] sm:$0xff]  ;;  %s372_s2 = smov [#allocation8]   ;;  %s225_s5 = sshll.u32 %s414_s3, 4  ;;  %s226_s5 = int_to_ptr.hbm [resolvable:$true] %s225_s5 }
  0x10   :  { %178 = vmatpush.msra.mxu2 %v111_v0  ;;  %v110_v2 = vld [vmem:[#allocation5 + $0x170] sm:$0xff]  ;;  %v109_v3 = vld [vmem:[#allocation5 + $0x168] sm:$0xff]  ;;  %v107_v5 = vld [vmem:[#allocation5 + $0x158] sm:$0xff]  ;;  %s223_s29 = sshll.u32 %s372_s2, 4  ;;  %s224_s29 = int_to_ptr.vmem [resolvable:$true] %s223_s29 }
  0x11   :  { %v105_v4 = vld [vmem:[#allocation5 + $0x148] sm:$0xff]  ;;  %149 = vmatpush.msra.mxu1 %v110_v2  ;;  %239 = vmatpush.msra.mxu3 %v109_v3  ;;  %v106_v6 = vld [vmem:[#allocation5 + $0x150] sm:$0xff]  ;;  %v104_v7 = vld [vmem:[#allocation5 + $0x140] sm:$0xff] }
  0x12   :  { %179 = vmatpush.msra.mxu2 %v108_v1  ;;  %v103_v8 = vld [vmem:[#allocation5 + $0x138] sm:$0xff]  ;;  %120 = vmatpush.msra.mxu0 %v109_v3  ;;  %v102_v9 = vld [vmem:[#allocation5 + $0x130] sm:$0xff]  ;;  %v101_v10 = vld [vmem:[#allocation5 + $0x128] sm:$0xff] }
  0x13   :  { %150 = vmatpush.msra.mxu1 %v107_v5  ;;  %240 = vmatpush.msra.mxu3 %v106_v6  ;;  %v100_v11 = vld [vmem:[#allocation5 + $0x120] sm:$0xff]  ;;  %v99_v12 = vld [vmem:[#allocation5 + $0x118] sm:$0xff]  ;;  %v98_v13 = vld [vmem:[#allocation5 + $0x110] sm:$0xff] }
  0x14   :  { %180 = vmatpush.msra.mxu2 %v105_v4  ;;  %121 = vmatpush.msra.mxu0 %v106_v6  ;;  %v97_v14 = vld [vmem:[#allocation5 + $0x108] sm:$0xff]  ;;  %v96_v15 = vld [vmem:[#allocation5 + $0x100] sm:$0xff]  ;;  %v95_v16 = vld [vmem:[#allocation5 + $0xf8] sm:$0xff] }
  0x15   :  { %151 = vmatpush.msra.mxu1 %v104_v7  ;;  %241 = vmatpush.msra.mxu3 %v103_v8  ;;  %v94_v17 = vld [vmem:[#allocation5 + $0xf0] sm:$0xff]  ;;  %v93_v18 = vld [vmem:[#allocation5 + $0xe8] sm:$0xff]  ;;  %v92_v19 = vld [vmem:[#allocation5 + $0xe0] sm:$0xff] }
  0x16   :  { %181 = vmatpush.msra.mxu2 %v102_v9  ;;  %122 = vmatpush.msra.mxu0 %v103_v8  ;;  %v91_v20 = vld [vmem:[#allocation5 + $0xd8] sm:$0xff]  ;;  %v90_v21 = vld [vmem:[#allocation5 + $0xd0] sm:$0xff]  ;;  %v89_v22 = vld [vmem:[#allocation5 + $0xc8] sm:$0xff] }
  0x17   :  { %152 = vmatpush.msra.mxu1 %v101_v10  ;;  %242 = vmatpush.msra.mxu3 %v100_v11  ;;  %v88_v23 = vld [vmem:[#allocation5 + $0xc0] sm:$0xff]  ;;  %v87_v24 = vld [vmem:[#allocation5 + $0xb8] sm:$0xff]  ;;  %v86_v25 = vld [vmem:[#allocation5 + $0xb0] sm:$0xff] }
  0x18   :  { %182 = vmatpush.msra.mxu2 %v99_v12  ;;  %123 = vmatpush.msra.mxu0 %v100_v11  ;;  %v85_v26 = vld [vmem:[#allocation5 + $0xa8] sm:$0xff]  ;;  %v84_v27 = vld [vmem:[#allocation5 + $0xa0] sm:$0xff]  ;;  %v83_v28 = vld [vmem:[#allocation5 + $0x98] sm:$0xff] }
  0x19   :  { %153 = vmatpush.msra.mxu1 %v98_v13  ;;  %243 = vmatpush.msra.mxu3 %v97_v14  ;;  %v82_v29 = vld [vmem:[#allocation5 + $0x90] sm:$0xff]  ;;  %v81_v30 = vld [vmem:[#allocation5 + $0x88] sm:$0xff]  ;;  %v80_v31 = vld [vmem:[#allocation5 + $0x80] sm:$0xff] }
  0x1a   :  { %183 = vmatpush.msra.mxu2 %v96_v15  ;;  %124 = vmatpush.msra.mxu0 %v97_v14  ;;  %v79_v32 = vld [vmem:[#allocation5 + $0x78] sm:$0xff]  ;;  %v78_v33 = vld [vmem:[#allocation5 + $0x70] sm:$0xff]  ;;  %v77_v34 = vld [vmem:[#allocation5 + $0x68] sm:$0xff] }
  0x1b   :  { %154 = vmatpush.msra.mxu1 %v95_v16  ;;  %244 = vmatpush.msra.mxu3 %v94_v17  ;;  %v76_v35 = vld [vmem:[#allocation5 + $0x60] sm:$0xff]  ;;  %v75_v36 = vld [vmem:[#allocation5 + $0x58] sm:$0xff]  ;;  %v74_v37 = vld [vmem:[#allocation5 + $0x50] sm:$0xff] }
  0x1c   :  { %184 = vmatpush.msra.mxu2 %v93_v18  ;;  %125 = vmatpush.msra.mxu0 %v94_v17  ;;  %v73_v38 = vld [vmem:[#allocation5 + $0x48] sm:$0xff]  ;;  %v72_v39 = vld [vmem:[#allocation5 + $0x40] sm:$0xff]  ;;  %v71_v40 = vld [vmem:[#allocation5 + $0x38] sm:$0xff] }
  0x1d   :  { %155 = vmatpush.msra.mxu1 %v92_v19  ;;  %245 = vmatpush.msra.mxu3 %v91_v20  ;;  %v70_v41 = vld [vmem:[#allocation5 + $0x30] sm:$0xff]  ;;  %v69_v42 = vld [vmem:[#allocation5 + $0x28] sm:$0xff]  ;;  %v68_v43 = vld [vmem:[#allocation5 + $0x20] sm:$0xff] }
  0x1e   :  { %185 = vmatpush.msra.mxu2 %v90_v21  ;;  %126 = vmatpush.msra.mxu0 %v91_v20  ;;  %v67_v44 = vld [vmem:[#allocation5 + $0x18] sm:$0xff]  ;;  %v66_v45 = vld [vmem:[#allocation5 + $0x10] sm:$0xff]  ;;  %v60_v46 = vld [vmem:[#allocation2] sm:$0xff] }
  0x1f   :  { %156 = vmatpush.msra.mxu1 %v89_v22  ;;  %246 = vmatpush.msra.mxu3 %v88_v23  ;;  %v65_v47 = vld [vmem:[#allocation5 + $0x8] sm:$0xff]  ;;  %v64_v48 = vld [vmem:[#allocation5] sm:$0xff]  ;;  %v62_v50 = vld [vmem:[#allocation2 + $0x10] sm:$0xff] }
  0x20   :  { %186 = vmatpush.msra.mxu2 %v87_v24  ;;  %127 = vmatpush.msra.mxu0 %v88_v23  ;;  %v61_v49 = vld [vmem:[#allocation2 + $0x8] sm:$0xff]  ;;  %v63_v51 = vld [vmem:[#allocation2 + $0x18] sm:$0xff]  ;;  %v112_v52 = vld [vmem:[#allocation7] sm:$0x7] }
  0x21   :  { %157 = vmatpush.msra.mxu1 %v86_v25  ;;  %247 = vmatpush.msra.mxu3 %v85_v26  ;;  %v115_v53 = vperm.slane %v112_v52, 1  ;;  %v114_v56 = vperm.slane %v112_v52, 0  ;;  %v116_v57 = vperm.slane %v112_v52, 2 }
  0x22   :  { %187 = vmatpush.msra.mxu2 %v84_v27  ;;  %128 = vmatpush.msra.mxu0 %v85_v26 }
  0x23   :  { %158 = vmatpush.msra.mxu1 %v83_v28  ;;  %248 = vmatpush.msra.mxu3 %v82_v29 }
  0x24   :  { %188 = vmatpush.msra.mxu2 %v81_v30  ;;  %129 = vmatpush.msra.mxu0 %v82_v29 }
  0x25   :  { %159 = vmatpush.msra.mxu1 %v80_v31  ;;  %249 = vmatpush.msra.mxu3 %v79_v32 }
  0x26   :  { %189 = vmatpush.msra.mxu2 %v78_v33  ;;  %130 = vmatpush.msra.mxu0 %v79_v32 }
  0x27   :  { %160 = vmatpush.msra.mxu1 %v77_v34  ;;  %250 = vmatpush.msra.mxu3 %v76_v35 }
  0x28   :  { %190 = vmatpush.msra.mxu2 %v75_v36  ;;  %131 = vmatpush.msra.mxu0 %v76_v35 }
  0x29   :  { %161 = vmatpush.msra.mxu1 %v74_v37  ;;  %251 = vmatpush.msra.mxu3 %v73_v38 }
  0x2a   :  { %191 = vmatpush.msra.mxu2 %v72_v39  ;;  %132 = vmatpush.msra.mxu0 %v73_v38 }
  0x2b   :  { %162 = vmatpush.msra.mxu1 %v71_v40  ;;  %252 = vmatpush.msra.mxu3 %v70_v41 }
  0x2c   :  { %192 = vmatpush.msra.mxu2 %v69_v42  ;;  %133 = vmatpush.msra.mxu0 %v70_v41 }
  0x2d   :  { %163 = vmatpush.msra.mxu1 %v68_v43  ;;  %253 = vmatpush.msra.mxu3 %v67_v44 }
  0x2e   :  { %193 = vmatpush.msra.mxu2 %v66_v45  ;;  %134 = vmatpush.msra.mxu0 %v67_v44 }
  0x2f   :  { %194 = vmatmul.f32.vlgmr.msra.gmra.mxu2 %v60_v46  ;;  %164 = vmatpush.msra.mxu1 %v65_v47 }
  0x30   :  { %165 = vmatmul.f32.vlgmr.msra.gmra.mxu1 %v60_v46  ;;  %254 = vmatpush.msra.mxu3 %v64_v48 }
  0x31   :  { %139 = vmatmul.f32.vlgmr.msra.gmra.mxu3 %v61_v49  ;;  %135 = vmatpush.msra.mxu0 %v64_v48 }
  0x32   :  { %136 = vmatmul.f32.vlgmr.msra.gmra.mxu0 %v60_v46 }
  0x37   :  { %197 = vmatmul.f32.gmra.mxu2 %v61_v49 }
  0x38   :  { %168 = vmatmul.f32.gmra.mxu1 %v61_v49 }
  0x39   :  { %142 = vmatmul.f32.gmra.mxu3 %v62_v50 }
  0x3f   :  { %200 = vmatmul.f32.gmra.mxu2 %v62_v50 }
  0x40   :  { %171 = vmatmul.f32.gmra.mxu1 %v62_v50 }
  0x41   :  { %145 = vmatmul.f32.gmra.mxu3 %v63_v51 }
  0x47   :  { %203 = vmatmul.f32.gmra.mxu2 %v63_v51 }
  0x48   :  { %174 = vmatmul.f32.gmra.mxu1 %v63_v51 }
  0xad   :  { %v166_v54 = vpop.f32.mrf.mxu1 }
  0xae   :  { %v167_v55 = vadd.f32 %v166_v54, %v115_v53 }
  0xaf   :  { %v137_v58 = vpop.f32.mrf.mxu0 }
  0xb0   :  { %208 = vst [vmem:[#allocation8 + $0x8] sm:$0xff] %v167_v55  ;;  %v138_v59 = vadd.f32 %v137_v58, %v114_v56 }
  0xb2   :  { %v195_v60 = vpop.f32.mrf.mxu2  ;;  %207 = vst [vmem:[#allocation8] sm:$0xff] %v138_v59 }
  0xb3   :  { %v196_v61 = vadd.f32 %v195_v60, %v116_v57 }
  0xb4   :  { %v140_v62 = vpop.f32.mrf.mxu3 }
  0xb5   :  { %209 = vst [vmem:[#allocation8 + $0x10] sm:$0xff] %v196_v61  ;;  %v141_v63 = vadd.f32 %v140_v62, %v114_v56  ;;  %v169_v0 = vpop.f32.mrf.mxu1 }
  0xb6   :  { %v170_v1 = vadd.f32 %v169_v0, %v115_v53 }
  0xb7   :  { %210 = vst [vmem:[#allocation8 + $0x18] sm:$0xff] %v141_v63 }
  0xb8   :  { %211 = vst [vmem:[#allocation8 + $0x20] sm:$0xff] %v170_v1 }
  0xba   :  { %v198_v2 = vpop.f32.mrf.mxu2 }
  0xbb   :  { %v199_v3 = vadd.f32 %v198_v2, %v116_v57 }
  0xbc   :  { %v143_v4 = vpop.f32.mrf.mxu3 }
  0xbd   :  { %212 = vst [vmem:[#allocation8 + $0x28] sm:$0xff] %v199_v3  ;;  %v144_v5 = vadd.f32 %v143_v4, %v114_v56  ;;  %v172_v6 = vpop.f32.mrf.mxu1 }
  0xbe   :  { %v173_v7 = vadd.f32 %v172_v6, %v115_v53 }
  0xbf   :  { %213 = vst [vmem:[#allocation8 + $0x30] sm:$0xff] %v144_v5 }
  0xc0   :  { %214 = vst [vmem:[#allocation8 + $0x38] sm:$0xff] %v173_v7 }
  0xc2   :  { %v201_v8 = vpop.f32.mrf.mxu2 }
  0xc3   :  { %v202_v9 = vadd.f32 %v201_v8, %v116_v57 }
  0xc4   :  { %v146_v10 = vpop.f32.mrf.mxu3 }
  0xc5   :  { %215 = vst [vmem:[#allocation8 + $0x40] sm:$0xff] %v202_v9  ;;  %v147_v11 = vadd.f32 %v146_v10, %v114_v56  ;;  %v175_v12 = vpop.f32.mrf.mxu1 }
  0xc6   :  { %v176_v13 = vadd.f32 %v175_v12, %v115_v53 }
  0xc7   :  { %216 = vst [vmem:[#allocation8 + $0x48] sm:$0xff] %v147_v11 }
  0xc8   :  { %217 = vst [vmem:[#allocation8 + $0x50] sm:$0xff] %v176_v13 }
  0xca   :  { %v204_v14 = vpop.f32.mrf.mxu2 }
  0xcb   :  { %v205_v15 = vadd.f32 %v204_v14, %v116_v57 }
  0xcd   :  { %218 = vst [vmem:[#allocation8 + $0x58] sm:$0xff] %v205_v15 }
  0xce   :  { %231 = dma.vmem_to_hbm [thread:$0]  %s224_s29, 1536, %s226_s5, [#allocation4], %s366_s20, %s366_s20, %s367_s21  }
  0xcf   :  { %363 = dma.done.wait [#allocation4], 1536  }
  0xd0   :  { %364 = vsyncadd [#allocation4], 4294965760 }
  0xd1   :  { %236 = vsyncpa [#allocation3], 1 }
  0xd2   :  { %237 = vsyncpa [#allocation6], 1 }
  0xd3   :  { %238 = vsyncpa [#allocation4], 1 }

</bundles_post_ra>
